<compile_context>
chip_gen: v6e
topology: v6e:2x2x1
jax: 0.10.0
libtpu: 0.0.40
codegen_flags: <defaults>
</compile_context>

<pallas_src>
import functools

import jax
import jax.numpy as jnp
from jax.experimental import pallas as pl
from jax.experimental.pallas import tpu as pltpu

LANE = 128
_MAX_BATCH_BLOCK = 256            # multiple of 8/16/32 -> legal sublane tile for any dtype
_MAX_FEATURE_TILE = 8192          # keeps the unrolled lane-fold short (<= 64 groups)
_INPUT_VMEM_BUDGET = 8 * 1024 * 1024   # pipelined (double-buffered) input blocks


def _dice_kernel(x_ref, t_ref, o_ref, inter_acc, tot_acc, *, n, f, bn, tf, smooth):
    b = pl.program_id(0)
    j = pl.program_id(1)

    @pl.when(j == 0)
    def _():
        inter_acc[...] = jnp.zeros_like(inter_acc)
        tot_acc[...] = jnp.zeros_like(tot_acc)

    x = x_ref[...].astype(jnp.float32)          # [bn, tf]
    t = t_ref[...].astype(jnp.float32)          # [bn, tf]

    # Mask the ragged edges of partial blocks (only emitted when the static
    # shapes require it).  Mandatory: OOB block regions are not zero-filled.
    mask = None
    if f % tf != 0:
        col = jax.lax.broadcasted_iota(jnp.int32, (bn, tf), 1)
        mask = col < (f - j * tf)
    if n % bn != 0:
        row = jax.lax.broadcasted_iota(jnp.int32, (bn, tf), 0)
        rmask = row < (n - b * bn)
        mask = rmask if mask is None else (mask & rmask)
    if mask is not None:
        x = jnp.where(mask, x, 0.0)
        t = jnp.where(mask, t, 0.0)

    prod = x * t            # intersection terms
    tot = x + t             # sum(x) + sum(t) fused into one stream

    # Lane-dense partial accumulation: fold tf lanes down to 128 with pure VPU
    # adds (static 128-lane slices are free vreg selections); defer the single
    # cross-lane XLU reduce to the final step.
    pi = prod[:, 0:LANE]
    si = tot[:, 0:LANE]
    for g in range(1, tf // LANE):
        pi = pi + prod[:, g * LANE:(g + 1) * LANE]
        si = si + tot[:, g * LANE:(g + 1) * LANE]
    inter_acc[...] += pi
    tot_acc[...] += si

    @pl.when(j == pl.num_programs(1) - 1)
    def _():
        inter = jnp.sum(inter_acc[...], axis=-1, keepdims=True)   # [bn, 1]
        total = jnp.sum(tot_acc[...], axis=-1, keepdims=True)     # [bn, 1]
        o_ref[...] = (2.0 * (inter + smooth)) / (total + smooth)  # per-sample dice


def dice_loss(inp, tgt, smooth=1.0):
    """Pallas DiceLoss forward. inp/tgt: any shape [N, ...] (torch .view(N,-1))."""
    assert inp.shape == tgt.shape, (inp.shape, tgt.shape)
    n = inp.shape[0]

    # torch .view(N, -1); keep native floating dtype (kernel upcasts tiles to f32).
    x = inp.reshape(n, -1)
    t = tgt.reshape(n, -1)
    if not jnp.issubdtype(x.dtype, jnp.floating):
        x = x.astype(jnp.float32)
    if not jnp.issubdtype(t.dtype, jnp.floating):
        t = t.astype(jnp.float32)
    f = x.shape[1]

    # Batch block: whole batch when small (full-dim blocks are always legal),
    # otherwise a 256-row chunk; ragged last block is masked in-kernel.
    bn = n if n <= _MAX_BATCH_BLOCK else _MAX_BATCH_BLOCK

    # Feature tile: lane multiple, sized so that 2 inputs x 2 pipeline buffers
    # of the physically-padded block stay within the VMEM budget.
    sub = 32 // min(x.dtype.itemsize, t.dtype.itemsize)      # 8 f32 / 16 bf16 / 32 int8
    bn_pad = ((bn + sub - 1) // sub) * sub
    bytes_per_col = 2 * bn_pad * (x.dtype.itemsize + t.dtype.itemsize)
    tf = _INPUT_VMEM_BUDGET // max(bytes_per_col, 1)
    tf = min(tf, _MAX_FEATURE_TILE, ((f + LANE - 1) // LANE) * LANE)
    tf = max(LANE, (tf // LANE) * LANE)

    grid = (pl.cdiv(n, bn), pl.cdiv(f, tf))

    kernel = functools.partial(
        _dice_kernel, n=n, f=f, bn=bn, tf=tf, smooth=float(smooth)
    )

    per_sample = pl.pallas_call(
        kernel,
        out_shape=jax.ShapeDtypeStruct((n, 1), jnp.float32),
        grid_spec=pltpu.PrefetchScalarGridSpec(
            num_scalar_prefetch=0,
            grid=grid,
            in_specs=[
                pl.BlockSpec((bn, tf), lambda b, j: (b, j)),
                pl.BlockSpec((bn, tf), lambda b, j: (b, j)),
            ],
            out_specs=pl.BlockSpec((bn, 1), lambda b, j: (b, 0)),
            scratch_shapes=[
                pltpu.VMEM((bn, LANE), jnp.float32),   # intersection partials
                pltpu.VMEM((bn, LANE), jnp.float32),   # sum(x)+sum(t) partials
            ],
        ),
        compiler_params=pltpu.CompilerParams(
            # batch axis can be sharded across TensorCores (v7x megacore);
            # the feature axis is the reduction -> "arbitrary" (and last).
            dimension_semantics=("parallel", "arbitrary"),
        ),
    )(x, t)

    # Tiny final reduction stays in the wrapper so each core only writes its
    # own batch rows (no shared (1,1) output block between TensorCores).
    return (1.0 - jnp.sum(per_sample) / n).astype(jnp.float32)


# ---------------------- pure-JAX reference (for verification) ----------------------
def reference_dice_loss(inp, tgt, smooth=1.0):
    n = inp.shape[0]
    xi = inp.reshape(n, -1)
    ti = tgt.reshape(n, -1)
    inter = jnp.sum(xi * ti, axis=1)
    per = 2.0 * (inter + smooth) / (jnp.sum(xi, axis=1) + jnp.sum(ti, axis=1) + smooth)
    return 1.0 - jnp.sum(per) / n


if __name__ == "__main__":
    key = jax.random.PRNGKey(0)
    k1, k2 = jax.random.split(key)
    # torch-style [N, C, H, W]: prediction probabilities and a binary mask
    pred = jax.random.uniform(k1, (2, 4, 16, 16), dtype=jnp.float32)
    target = (jax.random.uniform(k2, (2, 4, 16, 16)) > 0.5).astype(jnp.float32)

    loss = jax.block_until_ready(dice_loss(pred, target, smooth=1.0))
    ref = reference_dice_loss(pred, target, smooth=1.0)

    assert loss.shape == ()
    assert bool(jnp.abs(loss - ref) < 1e-5), (float(loss), float(ref))

    print("KERNEL_OK")
</pallas_src>

<mosaic_0001>
module attributes {stable_mosaic.version = 11 : i64} {
  func.func @_dice_kernel(%arg0: i32, %arg1: i32, %arg2: memref<2x1024xf32, #tpu.memory_space<vmem>>, %arg3: memref<2x1024xf32, #tpu.memory_space<vmem>>, %arg4: memref<2x1xf32, #tpu.memory_space<vmem>>, %arg5: memref<2x128xf32, #tpu.memory_space<vmem>>, %arg6: memref<2x128xf32, #tpu.memory_space<vmem>>) attributes {dimension_semantics = [#tpu.dimension_semantics<parallel>, #tpu.dimension_semantics<arbitrary>], iteration_bounds = array<i64: 1, 1>, scalar_prefetch = 0 : i64, scratch_operands = 2 : i64, tpu.core_type = #tpu.core_type<tc>, window_params = [{transform_indices = @transform_0, window_bounds = array<i64: 2, 1024>}, {transform_indices = @transform_1, window_bounds = array<i64: 2, 1024>}, {transform_indices = @transform_2, window_bounds = array<i64: 2, 1>}]} {
    %c0_i32 = arith.constant 0 : i32
    %0 = arith.cmpi eq, %arg1, %c0_i32 : i32
    %1 = arith.extui %0 : i1 to i32
    %c0_i32_0 = arith.constant 0 : i32
    %2 = arith.cmpi ne, %1, %c0_i32_0 : i32
    scf.if %2 {
      %cst = arith.constant 0.000000e+00 : f32
      %46 = vector.broadcast %cst : f32 to vector<2x128xf32>
      %c0_14 = arith.constant 0 : index
      %c0_15 = arith.constant 0 : index
      %47 = vector.load %arg5[%c0_14, %c0_15] : memref<2x128xf32, #tpu.memory_space<vmem>>, vector<2x128xf32>
      tpu.vector_store %arg5[%c0_14, %c0_15], %46 {strides = array<i32>} : memref<2x128xf32, #tpu.memory_space<vmem>>, vector<2x128xf32>,
      %cst_16 = arith.constant 0.000000e+00 : f32
      %48 = vector.broadcast %cst_16 : f32 to vector<2x128xf32>
      %c0_17 = arith.constant 0 : index
      %c0_18 = arith.constant 0 : index
      %49 = vector.load %arg6[%c0_17, %c0_18] : memref<2x128xf32, #tpu.memory_space<vmem>>, vector<2x128xf32>
      tpu.vector_store %arg6[%c0_17, %c0_18], %48 {strides = array<i32>} : memref<2x128xf32, #tpu.memory_space<vmem>>, vector<2x128xf32>,
    } else {
    }
    %c0 = arith.constant 0 : index
    %c0_1 = arith.constant 0 : index
    %3 = vector.load %arg2[%c0, %c0_1] : memref<2x1024xf32, #tpu.memory_space<vmem>>, vector<2x1024xf32>
    %c0_2 = arith.constant 0 : index
    %c0_3 = arith.constant 0 : index
    %4 = vector.load %arg3[%c0_2, %c0_3] : memref<2x1024xf32, #tpu.memory_space<vmem>>, vector<2x1024xf32>
    %5 = arith.mulf %3, %4 : vector<2x1024xf32>
    %6 = arith.addf %3, %4 : vector<2x1024xf32>
    %7 = vector.extract_strided_slice %5 {offsets = [0, 0], sizes = [2, 128], strides = [1, 1]} : vector<2x1024xf32> to vector<2x128xf32>
    %8 = vector.extract_strided_slice %6 {offsets = [0, 0], sizes = [2, 128], strides = [1, 1]} : vector<2x1024xf32> to vector<2x128xf32>
    %9 = vector.extract_strided_slice %5 {offsets = [0, 128], sizes = [2, 128], strides = [1, 1]} : vector<2x1024xf32> to vector<2x128xf32>
    %10 = arith.addf %7, %9 : vector<2x128xf32>
    %11 = vector.extract_strided_slice %6 {offsets = [0, 128], sizes = [2, 128], strides = [1, 1]} : vector<2x1024xf32> to vector<2x128xf32>
    %12 = arith.addf %8, %11 : vector<2x128xf32>
    %13 = vector.extract_strided_slice %5 {offsets = [0, 256], sizes = [2, 128], strides = [1, 1]} : vector<2x1024xf32> to vector<2x128xf32>
    %14 = arith.addf %10, %13 : vector<2x128xf32>
    %15 = vector.extract_strided_slice %6 {offsets = [0, 256], sizes = [2, 128], strides = [1, 1]} : vector<2x1024xf32> to vector<2x128xf32>
    %16 = arith.addf %12, %15 : vector<2x128xf32>
    %17 = vector.extract_strided_slice %5 {offsets = [0, 384], sizes = [2, 128], strides = [1, 1]} : vector<2x1024xf32> to vector<2x128xf32>
    %18 = arith.addf %14, %17 : vector<2x128xf32>
    %19 = vector.extract_strided_slice %6 {offsets = [0, 384], sizes = [2, 128], strides = [1, 1]} : vector<2x1024xf32> to vector<2x128xf32>
    %20 = arith.addf %16, %19 : vector<2x128xf32>
    %21 = vector.extract_strided_slice %5 {offsets = [0, 512], sizes = [2, 128], strides = [1, 1]} : vector<2x1024xf32> to vector<2x128xf32>
    %22 = arith.addf %18, %21 : vector<2x128xf32>
    %23 = vector.extract_strided_slice %6 {offsets = [0, 512], sizes = [2, 128], strides = [1, 1]} : vector<2x1024xf32> to vector<2x128xf32>
    %24 = arith.addf %20, %23 : vector<2x128xf32>
    %25 = vector.extract_strided_slice %5 {offsets = [0, 640], sizes = [2, 128], strides = [1, 1]} : vector<2x1024xf32> to vector<2x128xf32>
    %26 = arith.addf %22, %25 : vector<2x128xf32>
    %27 = vector.extract_strided_slice %6 {offsets = [0, 640], sizes = [2, 128], strides = [1, 1]} : vector<2x1024xf32> to vector<2x128xf32>
    %28 = arith.addf %24, %27 : vector<2x128xf32>
    %29 = vector.extract_strided_slice %5 {offsets = [0, 768], sizes = [2, 128], strides = [1, 1]} : vector<2x1024xf32> to vector<2x128xf32>
    %30 = arith.addf %26, %29 : vector<2x128xf32>
    %31 = vector.extract_strided_slice %6 {offsets = [0, 768], sizes = [2, 128], strides = [1, 1]} : vector<2x1024xf32> to vector<2x128xf32>
    %32 = arith.addf %28, %31 : vector<2x128xf32>
    %33 = vector.extract_strided_slice %5 {offsets = [0, 896], sizes = [2, 128], strides = [1, 1]} : vector<2x1024xf32> to vector<2x128xf32>
    %34 = arith.addf %30, %33 : vector<2x128xf32>
    %35 = vector.extract_strided_slice %6 {offsets = [0, 896], sizes = [2, 128], strides = [1, 1]} : vector<2x1024xf32> to vector<2x128xf32>
    %36 = arith.addf %32, %35 : vector<2x128xf32>
    %c0_4 = arith.constant 0 : index
    %c0_5 = arith.constant 0 : index
    %37 = vector.load %arg5[%c0_4, %c0_5] : memref<2x128xf32, #tpu.memory_space<vmem>>, vector<2x128xf32>
    %38 = arith.addf %37, %34 : vector<2x128xf32>
    %c0_6 = arith.constant 0 : index
    %c0_7 = arith.constant 0 : index
    %39 = vector.load %arg5[%c0_6, %c0_7] : memref<2x128xf32, #tpu.memory_space<vmem>>, vector<2x128xf32>
    tpu.vector_store %arg5[%c0_6, %c0_7], %38 {strides = array<i32>} : memref<2x128xf32, #tpu.memory_space<vmem>>, vector<2x128xf32>,
    %c0_8 = arith.constant 0 : index
    %c0_9 = arith.constant 0 : index
    %40 = vector.load %arg6[%c0_8, %c0_9] : memref<2x128xf32, #tpu.memory_space<vmem>>, vector<2x128xf32>
    %41 = arith.addf %40, %36 : vector<2x128xf32>
    %c0_10 = arith.constant 0 : index
    %c0_11 = arith.constant 0 : index
    %42 = vector.load %arg6[%c0_10, %c0_11] : memref<2x128xf32, #tpu.memory_space<vmem>>, vector<2x128xf32>
    tpu.vector_store %arg6[%c0_10, %c0_11], %41 {strides = array<i32>} : memref<2x128xf32, #tpu.memory_space<vmem>>, vector<2x128xf32>,
    %c0_i32_12 = arith.constant 0 : i32
    %43 = arith.cmpi eq, %arg1, %c0_i32_12 : i32
    %44 = arith.extui %43 : i1 to i32
    %c0_i32_13 = arith.constant 0 : i32
    %45 = arith.cmpi ne, %44, %c0_i32_13 : i32
    scf.if %45 {
      %c0_14 = arith.constant 0 : index
      %c0_15 = arith.constant 0 : index
      %46 = vector.load %arg5[%c0_14, %c0_15] : memref<2x128xf32, #tpu.memory_space<vmem>>, vector<2x128xf32>
      %cst = arith.constant dense<0.000000e+00> : vector<2xf32>
      %47 = vector.multi_reduction <add>, %46, %cst [1] : vector<2x128xf32> to vector<2xf32>
      %48 = vector.shape_cast %47 : vector<2xf32> to vector<2x1xf32>
      %c0_16 = arith.constant 0 : index
      %c0_17 = arith.constant 0 : index
      %49 = vector.load %arg6[%c0_16, %c0_17] : memref<2x128xf32, #tpu.memory_space<vmem>>, vector<2x128xf32>
      %cst_18 = arith.constant dense<0.000000e+00> : vector<2xf32>
      %50 = vector.multi_reduction <add>, %49, %cst_18 [1] : vector<2x128xf32> to vector<2xf32>
      %51 = vector.shape_cast %50 : vector<2xf32> to vector<2x1xf32>
      %cst_19 = arith.constant 1.000000e+00 : f32
      %52 = vector.broadcast %cst_19 : f32 to vector<2x1xf32>
      %53 = arith.addf %48, %52 : vector<2x1xf32>
      %cst_20 = arith.constant 2.000000e+00 : f32
      %54 = vector.broadcast %cst_20 : f32 to vector<2x1xf32>
      %55 = arith.mulf %54, %53 : vector<2x1xf32>
      %cst_21 = arith.constant 1.000000e+00 : f32
      %56 = vector.broadcast %cst_21 : f32 to vector<2x1xf32>
      %57 = arith.addf %51, %56 : vector<2x1xf32>
      %58 = arith.divf %55, %57 : vector<2x1xf32>
      %c0_22 = arith.constant 0 : index
      %c0_23 = arith.constant 0 : index
      %59 = vector.load %arg4[%c0_22, %c0_23] : memref<2x1xf32, #tpu.memory_space<vmem>>, vector<2x1xf32>
      tpu.vector_store %arg4[%c0_22, %c0_23], %58 {strides = array<i32>} : memref<2x1xf32, #tpu.memory_space<vmem>>, vector<2x1xf32>,
    } else {
    }
    return
  }
  func.func @transform_0(%arg0: i32, %arg1: i32) -> (i32, i32) {
    %c0_i32 = arith.constant 0 : i32
    return %arg0, %arg1 : i32, i32
  }
  func.func @transform_1(%arg0: i32, %arg1: i32) -> (i32, i32) {
    %c0_i32 = arith.constant 0 : i32
    return %arg0, %arg1 : i32, i32
  }
  func.func @transform_2(%arg0: i32, %arg1: i32) -> (i32, i32) {
    %c0_i32 = arith.constant 0 : i32
    %c0_i32_0 = arith.constant 0 : i32
    return %arg0, %c0_i32 : i32, i32
  }
}

</mosaic_0001>

<bundles_post_ra>
// kernel: tpu_custom_call.1
= control target key start
LH: loop header
LB: loop body
LE: loop exit
PB: predicated region body
PF: predicated region fallthrough
CT: control target
= control target key end

     0   :  { %7 = vsyncpa [#allocation5], 0  ;;  %s198_s0 = inlined_call_operand.hbm [shape: f32[2,1024], index: 0, kind: input, shape index: {}]   ;;  %s199_s1 = inlined_call_operand.hbm [shape: f32[2,1024], index: 1, kind: input, shape index: {}]   ;;  %s200_s2 = inlined_call_operand.vmem [shape: f32[2,1], index: 2, kind: output, shape index: {}]  }
   0x1   :  { %8 = vsyncpa [#allocation7], 0  ;;  %s171_s9 = smov [#allocation4]   ;;  %s172_s11 = smov [#allocation6]  }
   0x2   :  { %s15_s10 = sshll.u32 %s171_s9, 4  ;;  %s25_s12 = sshll.u32 %s172_s11, 4  ;;  %s16_s10 = int_to_ptr.vmem [resolvable:$true] %s15_s10  ;;  %s26_s12 = int_to_ptr.vmem [resolvable:$true] %s25_s12 }
   0x3   :  { %s135_s13 = scalar_lea.vmem %s16_s10, 256  ;;  %p140_p1 = scmp.lt.s32.totalorder %s16_s10, %s16_s10 }
   0x4   :  { %p136_p0 = scmp.ne.s32.totalorder %s16_s10, %s135_s13  ;;  %p141_p2 = scmp.lt.s32.totalorder %s135_s13, %s135_s13 }
   0x6   :  { %p142_p3 = por %p141_p2, %p140_p1 }
   0x8   :  { %p143_p4 = pnand %p142_p3, %p136_p0 }
   0xa   :  { %146 = shalt.err (!%p143_p4)
}
   0xb   :  { %18 = dma.hbm_to_vmem [thread:$0]  %s198_s0, 256, %s16_s10, [#allocation5]  }
   0xc   :  { %s155_s16 = scalar_lea.vmem %s26_s12, 256  ;;  %p160_p6 = scmp.lt.s32.totalorder %s26_s12, %s26_s12 }
   0xd   :  { %p156_p5 = scmp.ne.s32.totalorder %s26_s12, %s155_s16  ;;  %p161_p7 = scmp.lt.s32.totalorder %s155_s16, %s155_s16 }
   0xf   :  { %p162_p8 = por %p161_p7, %p160_p6 }
  0x11   :  { %p163_p9 = pnand %p162_p8, %p156_p5 }
  0x13   :  { %166 = shalt.err (!%p163_p9)
}
  0x14   :  { %28 = dma.hbm_to_vmem [thread:$0]  %s199_s1, 256, %s26_s12, [#allocation7]  }
  0x15   :  { %167 = dma.done.wait [#allocation5], 256  }
  0x16   :  { %168 = vsyncadd [#allocation5], 4294967040 }
  0x17   :  { %169 = dma.done.wait [#allocation7], 256  }
  0x18   :  { %170 = vsyncadd [#allocation7], 4294967040  ;;  %v173_v0 = vmov 0.0   ;;  %v41_v1 = vld [vmem:[#allocation4] sm:$0xff]  ;;  %v43_v2 = vld [vmem:[#allocation6] sm:$0xff]  ;;  %vm101_vm0 = vcmask 1041408  }
  0x19   :  { %40 = vst [vmem:[#allocation3] sm:$0x3] %v173_v0  ;;  %39 = vst [vmem:[#allocation2] sm:$0x3] %v173_v0  ;;  %v42_v3 = vld [vmem:[#allocation4 + $0x8] sm:$0xff]  ;;  %v44_v4 = vld [vmem:[#allocation6 + $0x8] sm:$0xff]  ;;  %v47_v5 = vadd.f32 %v43_v2, %v41_v1  ;;  %v45_v6 = vmul.f32 %v43_v2, %v41_v1 }
  0x1a   :  { %v48_v10 = vadd.f32 %v44_v4, %v42_v3  ;;  %v46_v11 = vmul.f32 %v44_v4, %v42_v3  ;;  %vm114_vm1 = vcmask 1024  }
  0x1b   :  { %v54_v7 = vrot.slane %v47_v5, 2  ;;  %v60_v8 = vrot.slane %v47_v5, 4  ;;  %v50_v9 = vrot.slane %v45_v6, 2  ;;  %v57_v12 = vrot.slane %v45_v6, 4 }
  0x1c   :  { %v66_v14 = vrot.slane %v47_v5, 6  ;;  %v63_v16 = vrot.slane %v45_v6, 6  ;;  %v76_v20 = vrot.slane %v48_v10, 2  ;;  %v72_v22 = vrot.slane %v46_v11, 2 }
  0x1d   :  { %v56_v13 = vadd.f32 %v54_v7, %v47_v5  ;;  %v52_v15 = vadd.f32 %v50_v9, %v45_v6  ;;  %v82_v24 = vrot.slane %v48_v10, 4  ;;  %v79_v26 = vrot.slane %v46_v11, 4 }
  0x1e   :  { %v88_v28 = vrot.slane %v48_v10, 6  ;;  %v85_v30 = vrot.slane %v46_v11, 6 }
  0x1f   :  { %v62_v17 = vadd.f32 %v60_v8, %v56_v13  ;;  %v59_v18 = vadd.f32 %v57_v12, %v52_v15 }
  0x20   :  { %v94_v33 = vld [vmem:[#allocation3] sm:$0x3]  ;;  %v91_v34 = vld [vmem:[#allocation2] sm:$0x3] }
  0x21   :  { %v68_v19 = vadd.f32 %v66_v14, %v62_v17  ;;  %v65_v21 = vadd.f32 %v63_v16, %v59_v18 }
  0x23   :  { %v70_v23 = vadd.f32 %v68_v19, %v48_v10  ;;  %v69_v25 = vadd.f32 %v65_v21, %v46_v11 }
  0x25   :  { %v78_v27 = vadd.f32 %v76_v20, %v70_v23  ;;  %v74_v29 = vadd.f32 %v72_v22, %v69_v25 }
  0x27   :  { %v84_v31 = vadd.f32 %v82_v24, %v78_v27  ;;  %v81_v32 = vadd.f32 %v79_v26, %v74_v29 }
  0x29   :  { %v90_v35 = vadd.f32 %v88_v28, %v84_v31  ;;  %v87_v36 = vadd.f32 %v85_v30, %v81_v32 }
  0x2b   :  { %v95_v37 = vadd.f32 %v94_v33, %v90_v35  ;;  %v92_v38 = vadd.f32 %v91_v34, %v87_v36 }
  0x2d   :  { %96 = vst [vmem:[#allocation3] sm:$0x3] %v95_v37  ;;  %93 = vst [vmem:[#allocation2] sm:$0x3] %v92_v38 }
  0x34   :  { %v105_v39 = vld [vmem:[#allocation3] sm:$0x3]  ;;  %v100_v40 = vld [vmem:[#allocation2] sm:$0x3] }
  0x35   :  { %v106_v41 = vsel %vm101_vm0, %v105_v39, 0.0  ;;  %v102_v42 = vsel %vm101_vm0, %v100_v40, 0.0 }
  0x36   :  { %107 = vadd.xlane.f32.xlu0 %v106_v41 }
  0x3a   :  { %103 = vadd.xlane.f32.xlu0 %v102_v42 }
  0xbf   :  { %v108_v43 = vpop.xlane.xlu0 %107 }
  0xc0   :  { %v111_v44 = vadd.f32 1.0, %v108_v43 }
  0xc2   :  { %125 = vrcp.f32 %v111_v44 }
  0xc3   :  { %v104_v45 = vpop.xlane.xlu0 %103 }
  0xc4   :  { %v109_v46 = vadd.f32 1.0, %v104_v45 }
  0xc6   :  { %v110_v47 = vmul.f32 2.0, %v109_v46 }
  0xcf   :  { %v126_v48 = vpop.eup %125 }
  0xd0   :  { %v113_v49 = vmul.f32 %v126_v48, %v110_v47 }
  0xd2   :  { %115 = vst.msk [vmem:[%s200_s2] sm:$0x3] %vm114_vm1, %v113_v49 }
  0xd3   :  { %120 = vsyncpa [#allocation5], 1 }
  0xd4   :  { %121 = vsyncpa [#allocation7], 1 }

</bundles_post_ra>
